<compile_context>
chip_gen: v7x
topology: tpu7x:2x2x1
jax: 0.10.0
libtpu: 0.0.40
codegen_flags: <defaults>
</compile_context>

<pallas_src>
import functools

import jax
import jax.numpy as jnp
from jax.experimental import pallas as pl
from jax.experimental.pallas import tpu as pltpu

BINS = 10
LOSS_WEIGHT = 1.0
LANES = 128
SUBLANES = 8
VREG = SUBLANES * LANES  # elements per (8, 128) vreg


def _round_up(x, m):
    return ((x + m - 1) // m) * m


def _ghmc_kernel(nvregs, pred_ref, target_ref, lw_ref, cnt_ref, sum_ref):
    """One grid step: per-bin counts / BCE partial sums of this tile.

    pred/target/lw refs: (tb, 8, 128) tiles of the lane-dense input.
    cnt/sum refs:        (1, BINS, 8, 128) per-step partial outputs.
    """
    tb = pred_ref.shape[0]
    step = pl.program_id(0)

    pred = pred_ref[...].astype(jnp.float32)
    target = target_ref[...].astype(jnp.float32)

    valid = lw_ref[...] > 0
    # Only when the tile size does not divide the input can the last grid
    # block contain out-of-range (garbage) vreg-rows; emit the mask only then.
    if nvregs % tb != 0:
        row = jax.lax.broadcasted_iota(jnp.int32, (tb, SUBLANES, LANES), 0)
        valid = valid & (step * tb + row < nvregs)

    # g = |sigmoid(pred) - target|; logistic runs on the EUP, not a VPU divide.
    g = jnp.abs(jax.nn.sigmoid(pred) - target)

    # Stable BCE-with-logits: max(x,0) - x*t + log1p(exp(-|x|)); exp/log on EUP.
    bce = jnp.maximum(pred, 0.0) - pred * target + jnp.log1p(jnp.exp(-jnp.abs(pred)))
    bce = jnp.where(valid, bce, 0.0)  # hoisted out of the bin loop

    # One bin index per element (int-cast truncation == floor for g >= 0);
    # invalid elements get the sentinel BINS so the loop needs no `& valid`.
    bin_idx = jnp.minimum((g * BINS).astype(jnp.int32), BINS - 1)
    bin_idx = jnp.where(valid, bin_idx, BINS)

    # Per-bin partial reductions over the tile's vreg-row axis only (pure VALU
    # adds); cross-sublane/lane reduction of these tiny outputs is left to the
    # JAX epilogue, keeping the hot loop off the XLU.
    for b in range(BINS):
        m = bin_idx == b
        cnt_ref[0, b] = jnp.sum(m.astype(jnp.float32), axis=0)
        sum_ref[0, b] = jnp.sum(jnp.where(m, bce, 0.0), axis=0)


def ghmc_loss(pred, target, label_weight, *, tile_rows=8192):
    """GHM-C loss (momentum=0). pred/target/label_weight: same-shape tensors.

    tile_rows: 128-lane rows per grid step. At the default 8192 the three
    double-buffered f32 input tiles use 3 * 2 * 4 MiB = 24 MiB of VMEM, which
    fits v5e/v6e (128 MiB) and v7x (64 MiB). Callers may pass bf16 pred/target
    and int8/bool label_weight to cut HBM traffic; the kernel upcasts to f32.
    """
    assert pred.shape == target.shape == label_weight.shape
    total = pred.size

    padded_total = _round_up(max(total, 1), VREG)
    pad = padded_total - total
    nvregs = padded_total // VREG
    tb = max(1, min(_round_up(tile_rows, SUBLANES) // SUBLANES, nvregs))
    grid = pl.cdiv(nvregs, tb)

    def _prep(x):
        flat = x.reshape(-1)
        if pad:
            # Padding with 0 => label_weight 0 => ignored (semantics-safe);
            # only hit when total is not already a multiple of 1024.
            flat = jnp.pad(flat, (0, pad))
        return flat.reshape(nvregs, SUBLANES, LANES)  # lane-dense view

    p3, t3, w3 = _prep(pred), _prep(target), _prep(label_weight)

    in_spec = pl.BlockSpec((tb, SUBLANES, LANES), lambda i: (i, 0, 0))
    out_spec = pl.BlockSpec((1, BINS, SUBLANES, LANES), lambda i: (i, 0, 0, 0))

    cnt_part, sum_part = pl.pallas_call(
        functools.partial(_ghmc_kernel, nvregs),
        out_shape=(
            jax.ShapeDtypeStruct((grid, BINS, SUBLANES, LANES), jnp.float32),
            jax.ShapeDtypeStruct((grid, BINS, SUBLANES, LANES), jnp.float32),
        ),
        grid=(grid,),
        in_specs=[in_spec, in_spec, in_spec],
        out_specs=(out_spec, out_spec),
        compiler_params=pltpu.CompilerParams(
            dimension_semantics=("parallel",),  # no carry -> megacore-shardable
            vmem_limit_bytes=32 * 1024 * 1024,
        ),
    )(p3, t3, w3)

    # Finalize on 2*BINS numbers (tot cancels algebraically):
    #   loss = loss_weight / n * sum_b S_b / num_b
    cnt = jnp.sum(cnt_part, axis=(0, 2, 3))  # (BINS,)
    s = jnp.sum(sum_part, axis=(0, 2, 3))    # (BINS,)
    has = cnt > 0.5
    n = jnp.sum(has.astype(jnp.float32))
    per_bin = jnp.where(has, s / jnp.maximum(cnt, 1.0), 0.0)
    loss = jnp.where(n > 0.0, jnp.sum(per_bin) / jnp.maximum(n, 1.0), 0.0)
    return loss * LOSS_WEIGHT


def _ghmc_ref(pred, target, label_weight):
    """Pure-JAX reference, faithful to the PyTorch forward (momentum=0)."""
    pred = pred.astype(jnp.float32)
    target = target.astype(jnp.float32)
    lw = label_weight.astype(jnp.float32)
    g = jnp.abs(1.0 / (1.0 + jnp.exp(-pred)) - target)
    valid = lw > 0
    tot = jnp.maximum(jnp.sum(valid.astype(jnp.float32)), 1.0)
    weights = jnp.zeros_like(pred)
    n = 0.0
    for i in range(BINS):
        lo = float(i) / BINS
        hi = float(i + 1) / BINS + (1e-6 if i == BINS - 1 else 0.0)
        inds = (g >= lo) & (g < hi) & valid
        num = jnp.sum(inds.astype(jnp.float32))
        has = num > 0
        w = jnp.where(has, tot / jnp.maximum(num, 1.0), 0.0)
        weights = jnp.where(inds, w, weights)
        n = n + jnp.where(has, 1.0, 0.0)
    weights = jnp.where(n > 0, weights / jnp.maximum(n, 1.0), weights)
    bce = jnp.maximum(pred, 0.0) - pred * target + jnp.log1p(jnp.exp(-jnp.abs(pred)))
    return jnp.sum(bce * weights) / tot * LOSS_WEIGHT


if __name__ == "__main__":
    key = jax.random.PRNGKey(0)
    k1, k2, k3, k4, k5, k6 = jax.random.split(key, 6)

    # Shapes matching the module interface [batch_num, class_num].
    N, C = 32, 16
    pred = jax.random.normal(k1, (N, C), dtype=jnp.float32) * 2.0
    target = jax.random.bernoulli(k2, p=0.3, shape=(N, C)).astype(jnp.float32)
    label_weight = jax.random.bernoulli(k3, p=0.9, shape=(N, C)).astype(jnp.float32)

    loss = ghmc_loss(pred, target, label_weight)
    jax.block_until_ready(loss)
    ref = _ghmc_ref(pred, target, label_weight)
    assert jnp.allclose(loss, ref, rtol=2e-4, atol=2e-4), (loss, ref)

    # Second check: multiple tiles + partial last block (mask path) +
    # sub-vreg tail padding (total = 27000, not a multiple of 1024).
    N2, C2 = 300, 90
    pred2 = jax.random.normal(k4, (N2, C2), dtype=jnp.float32) * 2.0
    target2 = jax.random.bernoulli(k5, p=0.2, shape=(N2, C2)).astype(jnp.float32)
    lw2 = jax.random.bernoulli(k6, p=0.8, shape=(N2, C2)).astype(jnp.float32)

    loss2 = ghmc_loss(pred2, target2, lw2, tile_rows=128)
    jax.block_until_ready(loss2)
    ref2 = _ghmc_ref(pred2, target2, lw2)
    assert jnp.allclose(loss2, ref2, rtol=2e-4, atol=2e-4), (loss2, ref2)

    print("KERNEL_OK")
</pallas_src>

<mosaic_0001>
module attributes {stable_mosaic.version = 11 : i64} {
  func.func @_ghmc_kernel(%arg0: i32, %arg1: memref<1x8x128xf32, #tpu.memory_space<vmem>>, %arg2: memref<1x8x128xf32, #tpu.memory_space<vmem>>, %arg3: memref<1x8x128xf32, #tpu.memory_space<vmem>>, %arg4: memref<1x10x8x128xf32, #tpu.memory_space<vmem>>, %arg5: memref<1x10x8x128xf32, #tpu.memory_space<vmem>>) attributes {dimension_semantics = [#tpu.dimension_semantics<parallel>], iteration_bounds = array<i64: 1>, scalar_prefetch = 0 : i64, scratch_operands = 0 : i64, tpu.core_type = #tpu.core_type<tc>, window_params = [{transform_indices = @transform_0, window_bounds = array<i64: 1, 8, 128>}, {transform_indices = @transform_1, window_bounds = array<i64: 1, 8, 128>}, {transform_indices = @transform_2, window_bounds = array<i64: 1, 8, 128>}, {transform_indices = @transform_3, window_bounds = array<i64: 1, 10, 8, 128>}, {transform_indices = @transform_4, window_bounds = array<i64: 1, 10, 8, 128>}]} {
    %c0 = arith.constant 0 : index
    %c0_0 = arith.constant 0 : index
    %c0_1 = arith.constant 0 : index
    %0 = vector.load %arg1[%c0, %c0_0, %c0_1] : memref<1x8x128xf32, #tpu.memory_space<vmem>>, vector<1x8x128xf32>
    %c0_2 = arith.constant 0 : index
    %c0_3 = arith.constant 0 : index
    %c0_4 = arith.constant 0 : index
    %1 = vector.load %arg2[%c0_2, %c0_3, %c0_4] : memref<1x8x128xf32, #tpu.memory_space<vmem>>, vector<1x8x128xf32>
    %c0_5 = arith.constant 0 : index
    %c0_6 = arith.constant 0 : index
    %c0_7 = arith.constant 0 : index
    %2 = vector.load %arg3[%c0_5, %c0_6, %c0_7] : memref<1x8x128xf32, #tpu.memory_space<vmem>>, vector<1x8x128xf32>
    %cst = arith.constant 0.000000e+00 : f32
    %3 = vector.broadcast %cst : f32 to vector<1x8x128xf32>
    %4 = arith.cmpf ogt, %2, %3 : vector<1x8x128xf32>
    %5 = arith.negf %0 : vector<1x8x128xf32>
    %6 = math.exp %5 : vector<1x8x128xf32>
    %cst_8 = arith.constant 1.000000e+00 : f32
    %7 = vector.broadcast %cst_8 : f32 to vector<1x8x128xf32>
    %8 = arith.addf %7, %6 : vector<1x8x128xf32>
    %9 = arith.divf %7, %8 : vector<1x8x128xf32>
    %10 = arith.subf %9, %1 : vector<1x8x128xf32>
    %11 = math.absf %10 : vector<1x8x128xf32>
    %cst_9 = arith.constant 0.000000e+00 : f32
    %12 = vector.broadcast %cst_9 : f32 to vector<1x8x128xf32>
    %13 = arith.maximumf %0, %12 : vector<1x8x128xf32>
    %14 = arith.mulf %0, %1 : vector<1x8x128xf32>
    %15 = arith.subf %13, %14 : vector<1x8x128xf32>
    %16 = math.absf %0 : vector<1x8x128xf32>
    %cst_10 = arith.constant 0.000000e+00 : f32
    %17 = vector.broadcast %cst_10 : f32 to vector<1x8x128xf32>
    %18 = arith.subf %17, %16 : vector<1x8x128xf32>
    %19 = math.exp %18 : vector<1x8x128xf32>
    %20 = math.log1p %19 : vector<1x8x128xf32>
    %21 = arith.addf %15, %20 : vector<1x8x128xf32>
    %cst_11 = arith.constant 0.000000e+00 : f32
    %22 = vector.broadcast %cst_11 : f32 to vector<1x8x128xf32>
    %23 = arith.select %4, %21, %22 : vector<1x8x128xi1>, vector<1x8x128xf32>
    %cst_12 = arith.constant 1.000000e+01 : f32
    %24 = vector.broadcast %cst_12 : f32 to vector<1x8x128xf32>
    %25 = arith.mulf %11, %24 : vector<1x8x128xf32>
    %26 = arith.fptosi %25 : vector<1x8x128xf32> to vector<1x8x128xi32>
    %c9_i32 = arith.constant 9 : i32
    %27 = vector.broadcast %c9_i32 : i32 to vector<1x8x128xi32>
    %28 = arith.minsi %26, %27 : vector<1x8x128xi32>
    %c10_i32 = arith.constant 10 : i32
    %29 = vector.broadcast %c10_i32 : i32 to vector<1x8x128xi32>
    %30 = arith.select %4, %28, %29 : vector<1x8x128xi1>, vector<1x8x128xi32>
    %c0_i32 = arith.constant 0 : i32
    %31 = vector.broadcast %c0_i32 : i32 to vector<1x8x128xi32>
    %32 = arith.cmpi eq, %30, %31 : vector<1x8x128xi32>
    %33 = arith.extui %32 : vector<1x8x128xi1> to vector<1x8x128xi32>
    %34 = arith.sitofp %33 : vector<1x8x128xi32> to vector<1x8x128xf32>
    %cst_13 = arith.constant dense<0.000000e+00> : vector<8x128xf32>
    %35 = vector.multi_reduction <add>, %34, %cst_13 [0] : vector<1x8x128xf32> to vector<8x128xf32>
    %c0_14 = arith.constant 0 : index
    %c0_15 = arith.constant 0 : index
    %c0_16 = arith.constant 0 : index
    %c0_17 = arith.constant 0 : index
    %36 = vector.load %arg4[%c0_14, %c0_15, %c0_16, %c0_17] : memref<1x10x8x128xf32, #tpu.memory_space<vmem>>, vector<1x1x8x128xf32>
    %37 = vector.shape_cast %36 : vector<1x1x8x128xf32> to vector<8x128xf32>
    %38 = vector.shape_cast %35 : vector<8x128xf32> to vector<1x1x8x128xf32>
    tpu.vector_store %arg4[%c0_14, %c0_15, %c0_16, %c0_17], %38 {strides = array<i32>} : memref<1x10x8x128xf32, #tpu.memory_space<vmem>>, vector<1x1x8x128xf32>,
    %cst_18 = arith.constant 0.000000e+00 : f32
    %39 = vector.broadcast %cst_18 : f32 to vector<1x8x128xf32>
    %40 = arith.select %32, %23, %39 : vector<1x8x128xi1>, vector<1x8x128xf32>
    %cst_19 = arith.constant dense<0.000000e+00> : vector<8x128xf32>
    %41 = vector.multi_reduction <add>, %40, %cst_19 [0] : vector<1x8x128xf32> to vector<8x128xf32>
    %c0_20 = arith.constant 0 : index
    %c0_21 = arith.constant 0 : index
    %c0_22 = arith.constant 0 : index
    %c0_23 = arith.constant 0 : index
    %42 = vector.load %arg5[%c0_20, %c0_21, %c0_22, %c0_23] : memref<1x10x8x128xf32, #tpu.memory_space<vmem>>, vector<1x1x8x128xf32>
    %43 = vector.shape_cast %42 : vector<1x1x8x128xf32> to vector<8x128xf32>
    %44 = vector.shape_cast %41 : vector<8x128xf32> to vector<1x1x8x128xf32>
    tpu.vector_store %arg5[%c0_20, %c0_21, %c0_22, %c0_23], %44 {strides = array<i32>} : memref<1x10x8x128xf32, #tpu.memory_space<vmem>>, vector<1x1x8x128xf32>,
    %c1_i32 = arith.constant 1 : i32
    %45 = vector.broadcast %c1_i32 : i32 to vector<1x8x128xi32>
    %46 = arith.cmpi eq, %30, %45 : vector<1x8x128xi32>
    %47 = arith.extui %46 : vector<1x8x128xi1> to vector<1x8x128xi32>
    %48 = arith.sitofp %47 : vector<1x8x128xi32> to vector<1x8x128xf32>
    %cst_24 = arith.constant dense<0.000000e+00> : vector<8x128xf32>
    %49 = vector.multi_reduction <add>, %48, %cst_24 [0] : vector<1x8x128xf32> to vector<8x128xf32>
    %c0_25 = arith.constant 0 : index
    %c1 = arith.constant 1 : index
    %c0_26 = arith.constant 0 : index
    %c0_27 = arith.constant 0 : index
    %50 = vector.load %arg4[%c0_25, %c1, %c0_26, %c0_27] : memref<1x10x8x128xf32, #tpu.memory_space<vmem>>, vector<1x1x8x128xf32>
    %51 = vector.shape_cast %50 : vector<1x1x8x128xf32> to vector<8x128xf32>
    %52 = vector.shape_cast %49 : vector<8x128xf32> to vector<1x1x8x128xf32>
    tpu.vector_store %arg4[%c0_25, %c1, %c0_26, %c0_27], %52 {strides = array<i32>} : memref<1x10x8x128xf32, #tpu.memory_space<vmem>>, vector<1x1x8x128xf32>,
    %cst_28 = arith.constant 0.000000e+00 : f32
    %53 = vector.broadcast %cst_28 : f32 to vector<1x8x128xf32>
    %54 = arith.select %46, %23, %53 : vector<1x8x128xi1>, vector<1x8x128xf32>
    %cst_29 = arith.constant dense<0.000000e+00> : vector<8x128xf32>
    %55 = vector.multi_reduction <add>, %54, %cst_29 [0] : vector<1x8x128xf32> to vector<8x128xf32>
    %c0_30 = arith.constant 0 : index
    %c1_31 = arith.constant 1 : index
    %c0_32 = arith.constant 0 : index
    %c0_33 = arith.constant 0 : index
    %56 = vector.load %arg5[%c0_30, %c1_31, %c0_32, %c0_33] : memref<1x10x8x128xf32, #tpu.memory_space<vmem>>, vector<1x1x8x128xf32>
    %57 = vector.shape_cast %56 : vector<1x1x8x128xf32> to vector<8x128xf32>
    %58 = vector.shape_cast %55 : vector<8x128xf32> to vector<1x1x8x128xf32>
    tpu.vector_store %arg5[%c0_30, %c1_31, %c0_32, %c0_33], %58 {strides = array<i32>} : memref<1x10x8x128xf32, #tpu.memory_space<vmem>>, vector<1x1x8x128xf32>,
    %c2_i32 = arith.constant 2 : i32
    %59 = vector.broadcast %c2_i32 : i32 to vector<1x8x128xi32>
    %60 = arith.cmpi eq, %30, %59 : vector<1x8x128xi32>
    %61 = arith.extui %60 : vector<1x8x128xi1> to vector<1x8x128xi32>
    %62 = arith.sitofp %61 : vector<1x8x128xi32> to vector<1x8x128xf32>
    %cst_34 = arith.constant dense<0.000000e+00> : vector<8x128xf32>
    %63 = vector.multi_reduction <add>, %62, %cst_34 [0] : vector<1x8x128xf32> to vector<8x128xf32>
    %c0_35 = arith.constant 0 : index
    %c2 = arith.constant 2 : index
    %c0_36 = arith.constant 0 : index
    %c0_37 = arith.constant 0 : index
    %64 = vector.load %arg4[%c0_35, %c2, %c0_36, %c0_37] : memref<1x10x8x128xf32, #tpu.memory_space<vmem>>, vector<1x1x8x128xf32>
    %65 = vector.shape_cast %64 : vector<1x1x8x128xf32> to vector<8x128xf32>
    %66 = vector.shape_cast %63 : vector<8x128xf32> to vector<1x1x8x128xf32>
    tpu.vector_store %arg4[%c0_35, %c2, %c0_36, %c0_37], %66 {strides = array<i32>} : memref<1x10x8x128xf32, #tpu.memory_space<vmem>>, vector<1x1x8x128xf32>,
    %cst_38 = arith.constant 0.000000e+00 : f32
    %67 = vector.broadcast %cst_38 : f32 to vector<1x8x128xf32>
    %68 = arith.select %60, %23, %67 : vector<1x8x128xi1>, vector<1x8x128xf32>
    %cst_39 = arith.constant dense<0.000000e+00> : vector<8x128xf32>
    %69 = vector.multi_reduction <add>, %68, %cst_39 [0] : vector<1x8x128xf32> to vector<8x128xf32>
    %c0_40 = arith.constant 0 : index
    %c2_41 = arith.constant 2 : index
    %c0_42 = arith.constant 0 : index
    %c0_43 = arith.constant 0 : index
    %70 = vector.load %arg5[%c0_40, %c2_41, %c0_42, %c0_43] : memref<1x10x8x128xf32, #tpu.memory_space<vmem>>, vector<1x1x8x128xf32>
    %71 = vector.shape_cast %70 : vector<1x1x8x128xf32> to vector<8x128xf32>
    %72 = vector.shape_cast %69 : vector<8x128xf32> to vector<1x1x8x128xf32>
    tpu.vector_store %arg5[%c0_40, %c2_41, %c0_42, %c0_43], %72 {strides = array<i32>} : memref<1x10x8x128xf32, #tpu.memory_space<vmem>>, vector<1x1x8x128xf32>,
    %c3_i32 = arith.constant 3 : i32
    %73 = vector.broadcast %c3_i32 : i32 to vector<1x8x128xi32>
    %74 = arith.cmpi eq, %30, %73 : vector<1x8x128xi32>
    %75 = arith.extui %74 : vector<1x8x128xi1> to vector<1x8x128xi32>
    %76 = arith.sitofp %75 : vector<1x8x128xi32> to vector<1x8x128xf32>
    %cst_44 = arith.constant dense<0.000000e+00> : vector<8x128xf32>
    %77 = vector.multi_reduction <add>, %76, %cst_44 [0] : vector<1x8x128xf32> to vector<8x128xf32>
    %c0_45 = arith.constant 0 : index
    %c3 = arith.constant 3 : index
    %c0_46 = arith.constant 0 : index
    %c0_47 = arith.constant 0 : index
    %78 = vector.load %arg4[%c0_45, %c3, %c0_46, %c0_47] : memref<1x10x8x128xf32, #tpu.memory_space<vmem>>, vector<1x1x8x128xf32>
    %79 = vector.shape_cast %78 : vector<1x1x8x128xf32> to vector<8x128xf32>
    %80 = vector.shape_cast %77 : vector<8x128xf32> to vector<1x1x8x128xf32>
    tpu.vector_store %arg4[%c0_45, %c3, %c0_46, %c0_47], %80 {strides = array<i32>} : memref<1x10x8x128xf32, #tpu.memory_space<vmem>>, vector<1x1x8x128xf32>,
    %cst_48 = arith.constant 0.000000e+00 : f32
    %81 = vector.broadcast %cst_48 : f32 to vector<1x8x128xf32>
    %82 = arith.select %74, %23, %81 : vector<1x8x128xi1>, vector<1x8x128xf32>
    %cst_49 = arith.constant dense<0.000000e+00> : vector<8x128xf32>
    %83 = vector.multi_reduction <add>, %82, %cst_49 [0] : vector<1x8x128xf32> to vector<8x128xf32>
    %c0_50 = arith.constant 0 : index
    %c3_51 = arith.constant 3 : index
    %c0_52 = arith.constant 0 : index
    %c0_53 = arith.constant 0 : index
    %84 = vector.load %arg5[%c0_50, %c3_51, %c0_52, %c0_53] : memref<1x10x8x128xf32, #tpu.memory_space<vmem>>, vector<1x1x8x128xf32>
    %85 = vector.shape_cast %84 : vector<1x1x8x128xf32> to vector<8x128xf32>
    %86 = vector.shape_cast %83 : vector<8x128xf32> to vector<1x1x8x128xf32>
    tpu.vector_store %arg5[%c0_50, %c3_51, %c0_52, %c0_53], %86 {strides = array<i32>} : memref<1x10x8x128xf32, #tpu.memory_space<vmem>>, vector<1x1x8x128xf32>,
    %c4_i32 = arith.constant 4 : i32
    %87 = vector.broadcast %c4_i32 : i32 to vector<1x8x128xi32>
    %88 = arith.cmpi eq, %30, %87 : vector<1x8x128xi32>
    %89 = arith.extui %88 : vector<1x8x128xi1> to vector<1x8x128xi32>
    %90 = arith.sitofp %89 : vector<1x8x128xi32> to vector<1x8x128xf32>
    %cst_54 = arith.constant dense<0.000000e+00> : vector<8x128xf32>
    %91 = vector.multi_reduction <add>, %90, %cst_54 [0] : vector<1x8x128xf32> to vector<8x128xf32>
    %c0_55 = arith.constant 0 : index
    %c4 = arith.constant 4 : index
    %c0_56 = arith.constant 0 : index
    %c0_57 = arith.constant 0 : index
    %92 = vector.load %arg4[%c0_55, %c4, %c0_56, %c0_57] : memref<1x10x8x128xf32, #tpu.memory_space<vmem>>, vector<1x1x8x128xf32>
    %93 = vector.shape_cast %92 : vector<1x1x8x128xf32> to vector<8x128xf32>
    %94 = vector.shape_cast %91 : vector<8x128xf32> to vector<1x1x8x128xf32>
    tpu.vector_store %arg4[%c0_55, %c4, %c0_56, %c0_57], %94 {strides = array<i32>} : memref<1x10x8x128xf32, #tpu.memory_space<vmem>>, vector<1x1x8x128xf32>,
    %cst_58 = arith.constant 0.000000e+00 : f32
    %95 = vector.broadcast %cst_58 : f32 to vector<1x8x128xf32>
    %96 = arith.select %88, %23, %95 : vector<1x8x128xi1>, vector<1x8x128xf32>
    %cst_59 = arith.constant dense<0.000000e+00> : vector<8x128xf32>
    %97 = vector.multi_reduction <add>, %96, %cst_59 [0] : vector<1x8x128xf32> to vector<8x128xf32>
    %c0_60 = arith.constant 0 : index
    %c4_61 = arith.constant 4 : index
    %c0_62 = arith.constant 0 : index
    %c0_63 = arith.constant 0 : index
    %98 = vector.load %arg5[%c0_60, %c4_61, %c0_62, %c0_63] : memref<1x10x8x128xf32, #tpu.memory_space<vmem>>, vector<1x1x8x128xf32>
    %99 = vector.shape_cast %98 : vector<1x1x8x128xf32> to vector<8x128xf32>
    %100 = vector.shape_cast %97 : vector<8x128xf32> to vector<1x1x8x128xf32>
    tpu.vector_store %arg5[%c0_60, %c4_61, %c0_62, %c0_63], %100 {strides = array<i32>} : memref<1x10x8x128xf32, #tpu.memory_space<vmem>>, vector<1x1x8x128xf32>,
    %c5_i32 = arith.constant 5 : i32
    %101 = vector.broadcast %c5_i32 : i32 to vector<1x8x128xi32>
    %102 = arith.cmpi eq, %30, %101 : vector<1x8x128xi32>
    %103 = arith.extui %102 : vector<1x8x128xi1> to vector<1x8x128xi32>
    %104 = arith.sitofp %103 : vector<1x8x128xi32> to vector<1x8x128xf32>
    %cst_64 = arith.constant dense<0.000000e+00> : vector<8x128xf32>
    %105 = vector.multi_reduction <add>, %104, %cst_64 [0] : vector<1x8x128xf32> to vector<8x128xf32>
    %c0_65 = arith.constant 0 : index
    %c5 = arith.constant 5 : index
    %c0_66 = arith.constant 0 : index
    %c0_67 = arith.constant 0 : index
    %106 = vector.load %arg4[%c0_65, %c5, %c0_66, %c0_67] : memref<1x10x8x128xf32, #tpu.memory_space<vmem>>, vector<1x1x8x128xf32>
    %107 = vector.shape_cast %106 : vector<1x1x8x128xf32> to vector<8x128xf32>
    %108 = vector.shape_cast %105 : vector<8x128xf32> to vector<1x1x8x128xf32>
    tpu.vector_store %arg4[%c0_65, %c5, %c0_66, %c0_67], %108 {strides = array<i32>} : memref<1x10x8x128xf32, #tpu.memory_space<vmem>>, vector<1x1x8x128xf32>,
    %cst_68 = arith.constant 0.000000e+00 : f32
    %109 = vector.broadcast %cst_68 : f32 to vector<1x8x128xf32>
    %110 = arith.select %102, %23, %109 : vector<1x8x128xi1>, vector<1x8x128xf32>
    %cst_69 = arith.constant dense<0.000000e+00> : vector<8x128xf32>
    %111 = vector.multi_reduction <add>, %110, %cst_69 [0] : vector<1x8x128xf32> to vector<8x128xf32>
    %c0_70 = arith.constant 0 : index
    %c5_71 = arith.constant 5 : index
    %c0_72 = arith.constant 0 : index
    %c0_73 = arith.constant 0 : index
    %112 = vector.load %arg5[%c0_70, %c5_71, %c0_72, %c0_73] : memref<1x10x8x128xf32, #tpu.memory_space<vmem>>, vector<1x1x8x128xf32>
    %113 = vector.shape_cast %112 : vector<1x1x8x128xf32> to vector<8x128xf32>
    %114 = vector.shape_cast %111 : vector<8x128xf32> to vector<1x1x8x128xf32>
    tpu.vector_store %arg5[%c0_70, %c5_71, %c0_72, %c0_73], %114 {strides = array<i32>} : memref<1x10x8x128xf32, #tpu.memory_space<vmem>>, vector<1x1x8x128xf32>,
    %c6_i32 = arith.constant 6 : i32
    %115 = vector.broadcast %c6_i32 : i32 to vector<1x8x128xi32>
    %116 = arith.cmpi eq, %30, %115 : vector<1x8x128xi32>
    %117 = arith.extui %116 : vector<1x8x128xi1> to vector<1x8x128xi32>
    %118 = arith.sitofp %117 : vector<1x8x128xi32> to vector<1x8x128xf32>
    %cst_74 = arith.constant dense<0.000000e+00> : vector<8x128xf32>
    %119 = vector.multi_reduction <add>, %118, %cst_74 [0] : vector<1x8x128xf32> to vector<8x128xf32>
    %c0_75 = arith.constant 0 : index
    %c6 = arith.constant 6 : index
    %c0_76 = arith.constant 0 : index
    %c0_77 = arith.constant 0 : index
    %120 = vector.load %arg4[%c0_75, %c6, %c0_76, %c0_77] : memref<1x10x8x128xf32, #tpu.memory_space<vmem>>, vector<1x1x8x128xf32>
    %121 = vector.shape_cast %120 : vector<1x1x8x128xf32> to vector<8x128xf32>
    %122 = vector.shape_cast %119 : vector<8x128xf32> to vector<1x1x8x128xf32>
    tpu.vector_store %arg4[%c0_75, %c6, %c0_76, %c0_77], %122 {strides = array<i32>} : memref<1x10x8x128xf32, #tpu.memory_space<vmem>>, vector<1x1x8x128xf32>,
    %cst_78 = arith.constant 0.000000e+00 : f32
    %123 = vector.broadcast %cst_78 : f32 to vector<1x8x128xf32>
    %124 = arith.select %116, %23, %123 : vector<1x8x128xi1>, vector<1x8x128xf32>
    %cst_79 = arith.constant dense<0.000000e+00> : vector<8x128xf32>
    %125 = vector.multi_reduction <add>, %124, %cst_79 [0] : vector<1x8x128xf32> to vector<8x128xf32>
    %c0_80 = arith.constant 0 : index
    %c6_81 = arith.constant 6 : index
    %c0_82 = arith.constant 0 : index
    %c0_83 = arith.constant 0 : index
    %126 = vector.load %arg5[%c0_80, %c6_81, %c0_82, %c0_83] : memref<1x10x8x128xf32, #tpu.memory_space<vmem>>, vector<1x1x8x128xf32>
    %127 = vector.shape_cast %126 : vector<1x1x8x128xf32> to vector<8x128xf32>
    %128 = vector.shape_cast %125 : vector<8x128xf32> to vector<1x1x8x128xf32>
    tpu.vector_store %arg5[%c0_80, %c6_81, %c0_82, %c0_83], %128 {strides = array<i32>} : memref<1x10x8x128xf32, #tpu.memory_space<vmem>>, vector<1x1x8x128xf32>,
    %c7_i32 = arith.constant 7 : i32
    %129 = vector.broadcast %c7_i32 : i32 to vector<1x8x128xi32>
    %130 = arith.cmpi eq, %30, %129 : vector<1x8x128xi32>
    %131 = arith.extui %130 : vector<1x8x128xi1> to vector<1x8x128xi32>
    %132 = arith.sitofp %131 : vector<1x8x128xi32> to vector<1x8x128xf32>
    %cst_84 = arith.constant dense<0.000000e+00> : vector<8x128xf32>
    %133 = vector.multi_reduction <add>, %132, %cst_84 [0] : vector<1x8x128xf32> to vector<8x128xf32>
    %c0_85 = arith.constant 0 : index
    %c7 = arith.constant 7 : index
    %c0_86 = arith.constant 0 : index
    %c0_87 = arith.constant 0 : index
    %134 = vector.load %arg4[%c0_85, %c7, %c0_86, %c0_87] : memref<1x10x8x128xf32, #tpu.memory_space<vmem>>, vector<1x1x8x128xf32>
    %135 = vector.shape_cast %134 : vector<1x1x8x128xf32> to vector<8x128xf32>
    %136 = vector.shape_cast %133 : vector<8x128xf32> to vector<1x1x8x128xf32>
    tpu.vector_store %arg4[%c0_85, %c7, %c0_86, %c0_87], %136 {strides = array<i32>} : memref<1x10x8x128xf32, #tpu.memory_space<vmem>>, vector<1x1x8x128xf32>,
    %cst_88 = arith.constant 0.000000e+00 : f32
    %137 = vector.broadcast %cst_88 : f32 to vector<1x8x128xf32>
    %138 = arith.select %130, %23, %137 : vector<1x8x128xi1>, vector<1x8x128xf32>
    %cst_89 = arith.constant dense<0.000000e+00> : vector<8x128xf32>
    %139 = vector.multi_reduction <add>, %138, %cst_89 [0] : vector<1x8x128xf32> to vector<8x128xf32>
    %c0_90 = arith.constant 0 : index
    %c7_91 = arith.constant 7 : index
    %c0_92 = arith.constant 0 : index
    %c0_93 = arith.constant 0 : index
    %140 = vector.load %arg5[%c0_90, %c7_91, %c0_92, %c0_93] : memref<1x10x8x128xf32, #tpu.memory_space<vmem>>, vector<1x1x8x128xf32>
    %141 = vector.shape_cast %140 : vector<1x1x8x128xf32> to vector<8x128xf32>
    %142 = vector.shape_cast %139 : vector<8x128xf32> to vector<1x1x8x128xf32>
    tpu.vector_store %arg5[%c0_90, %c7_91, %c0_92, %c0_93], %142 {strides = array<i32>} : memref<1x10x8x128xf32, #tpu.memory_space<vmem>>, vector<1x1x8x128xf32>,
    %c8_i32 = arith.constant 8 : i32
    %143 = vector.broadcast %c8_i32 : i32 to vector<1x8x128xi32>
    %144 = arith.cmpi eq, %30, %143 : vector<1x8x128xi32>
    %145 = arith.extui %144 : vector<1x8x128xi1> to vector<1x8x128xi32>
    %146 = arith.sitofp %145 : vector<1x8x128xi32> to vector<1x8x128xf32>
    %cst_94 = arith.constant dense<0.000000e+00> : vector<8x128xf32>
    %147 = vector.multi_reduction <add>, %146, %cst_94 [0] : vector<1x8x128xf32> to vector<8x128xf32>
    %c0_95 = arith.constant 0 : index
    %c8 = arith.constant 8 : index
    %c0_96 = arith.constant 0 : index
    %c0_97 = arith.constant 0 : index
    %148 = vector.load %arg4[%c0_95, %c8, %c0_96, %c0_97] : memref<1x10x8x128xf32, #tpu.memory_space<vmem>>, vector<1x1x8x128xf32>
    %149 = vector.shape_cast %148 : vector<1x1x8x128xf32> to vector<8x128xf32>
    %150 = vector.shape_cast %147 : vector<8x128xf32> to vector<1x1x8x128xf32>
    tpu.vector_store %arg4[%c0_95, %c8, %c0_96, %c0_97], %150 {strides = array<i32>} : memref<1x10x8x128xf32, #tpu.memory_space<vmem>>, vector<1x1x8x128xf32>,
    %cst_98 = arith.constant 0.000000e+00 : f32
    %151 = vector.broadcast %cst_98 : f32 to vector<1x8x128xf32>
    %152 = arith.select %144, %23, %151 : vector<1x8x128xi1>, vector<1x8x128xf32>
    %cst_99 = arith.constant dense<0.000000e+00> : vector<8x128xf32>
    %153 = vector.multi_reduction <add>, %152, %cst_99 [0] : vector<1x8x128xf32> to vector<8x128xf32>
    %c0_100 = arith.constant 0 : index
    %c8_101 = arith.constant 8 : index
    %c0_102 = arith.constant 0 : index
    %c0_103 = arith.constant 0 : index
    %154 = vector.load %arg5[%c0_100, %c8_101, %c0_102, %c0_103] : memref<1x10x8x128xf32, #tpu.memory_space<vmem>>, vector<1x1x8x128xf32>
    %155 = vector.shape_cast %154 : vector<1x1x8x128xf32> to vector<8x128xf32>
    %156 = vector.shape_cast %153 : vector<8x128xf32> to vector<1x1x8x128xf32>
    tpu.vector_store %arg5[%c0_100, %c8_101, %c0_102, %c0_103], %156 {strides = array<i32>} : memref<1x10x8x128xf32, #tpu.memory_space<vmem>>, vector<1x1x8x128xf32>,
    %c9_i32_104 = arith.constant 9 : i32
    %157 = vector.broadcast %c9_i32_104 : i32 to vector<1x8x128xi32>
    %158 = arith.cmpi eq, %30, %157 : vector<1x8x128xi32>
    %159 = arith.extui %158 : vector<1x8x128xi1> to vector<1x8x128xi32>
    %160 = arith.sitofp %159 : vector<1x8x128xi32> to vector<1x8x128xf32>
    %cst_105 = arith.constant dense<0.000000e+00> : vector<8x128xf32>
    %161 = vector.multi_reduction <add>, %160, %cst_105 [0] : vector<1x8x128xf32> to vector<8x128xf32>
    %c0_106 = arith.constant 0 : index
    %c9 = arith.constant 9 : index
    %c0_107 = arith.constant 0 : index
    %c0_108 = arith.constant 0 : index
    %162 = vector.load %arg4[%c0_106, %c9, %c0_107, %c0_108] : memref<1x10x8x128xf32, #tpu.memory_space<vmem>>, vector<1x1x8x128xf32>
    %163 = vector.shape_cast %162 : vector<1x1x8x128xf32> to vector<8x128xf32>
    %164 = vector.shape_cast %161 : vector<8x128xf32> to vector<1x1x8x128xf32>
    tpu.vector_store %arg4[%c0_106, %c9, %c0_107, %c0_108], %164 {strides = array<i32>} : memref<1x10x8x128xf32, #tpu.memory_space<vmem>>, vector<1x1x8x128xf32>,
    %cst_109 = arith.constant 0.000000e+00 : f32
    %165 = vector.broadcast %cst_109 : f32 to vector<1x8x128xf32>
    %166 = arith.select %158, %23, %165 : vector<1x8x128xi1>, vector<1x8x128xf32>
    %cst_110 = arith.constant dense<0.000000e+00> : vector<8x128xf32>
    %167 = vector.multi_reduction <add>, %166, %cst_110 [0] : vector<1x8x128xf32> to vector<8x128xf32>
    %c0_111 = arith.constant 0 : index
    %c9_112 = arith.constant 9 : index
    %c0_113 = arith.constant 0 : index
    %c0_114 = arith.constant 0 : index
    %168 = vector.load %arg5[%c0_111, %c9_112, %c0_113, %c0_114] : memref<1x10x8x128xf32, #tpu.memory_space<vmem>>, vector<1x1x8x128xf32>
    %169 = vector.shape_cast %168 : vector<1x1x8x128xf32> to vector<8x128xf32>
    %170 = vector.shape_cast %167 : vector<8x128xf32> to vector<1x1x8x128xf32>
    tpu.vector_store %arg5[%c0_111, %c9_112, %c0_113, %c0_114], %170 {strides = array<i32>} : memref<1x10x8x128xf32, #tpu.memory_space<vmem>>, vector<1x1x8x128xf32>,
    return
  }
  func.func @transform_0(%arg0: i32) -> (i32, i32, i32) {
    %c0_i32 = arith.constant 0 : i32
    %c0_i32_0 = arith.constant 0 : i32
    %c0_i32_1 = arith.constant 0 : i32
    return %arg0, %c0_i32, %c0_i32_0 : i32, i32, i32
  }
  func.func @transform_1(%arg0: i32) -> (i32, i32, i32) {
    %c0_i32 = arith.constant 0 : i32
    %c0_i32_0 = arith.constant 0 : i32
    %c0_i32_1 = arith.constant 0 : i32
    return %arg0, %c0_i32, %c0_i32_0 : i32, i32, i32
  }
  func.func @transform_2(%arg0: i32) -> (i32, i32, i32) {
    %c0_i32 = arith.constant 0 : i32
    %c0_i32_0 = arith.constant 0 : i32
    %c0_i32_1 = arith.constant 0 : i32
    return %arg0, %c0_i32, %c0_i32_0 : i32, i32, i32
  }
  func.func @transform_3(%arg0: i32) -> (i32, i32, i32, i32) {
    %c0_i32 = arith.constant 0 : i32
    %c0_i32_0 = arith.constant 0 : i32
    %c0_i32_1 = arith.constant 0 : i32
    %c0_i32_2 = arith.constant 0 : i32
    return %arg0, %c0_i32, %c0_i32_0, %c0_i32_1 : i32, i32, i32, i32
  }
  func.func @transform_4(%arg0: i32) -> (i32, i32, i32, i32) {
    %c0_i32 = arith.constant 0 : i32
    %c0_i32_0 = arith.constant 0 : i32
    %c0_i32_1 = arith.constant 0 : i32
    %c0_i32_2 = arith.constant 0 : i32
    return %arg0, %c0_i32, %c0_i32_0, %c0_i32_1 : i32, i32, i32, i32
  }
}

</mosaic_0001>

<bundles_post_ra>
// kernel: tpu_custom_call.1
= control target key start
LH: loop header
LB: loop body
LE: loop exit
PB: predicated region body
PF: predicated region fallthrough
CT: control target
= control target key end

     0   :  { %10 = vsyncpa [#allocation3], 0  ;;  %s469_s0 = inlined_call_operand.hbm [shape: f32[1,8,128], index: 0, kind: input, shape index: {}]   ;;  %s470_s1 = inlined_call_operand.hbm [shape: f32[1,8,128], index: 1, kind: input, shape index: {}]   ;;  %s471_s2 = inlined_call_operand.hbm [shape: f32[1,8,128], index: 2, kind: input, shape index: {}]   ;;  %s472_s3 = inlined_call_operand.hbm [shape: f32[1,10,8,128], index: 3, kind: output, shape index: {0}]   ;;  %s473_s4 = inlined_call_operand.hbm [shape: f32[1,10,8,128], index: 4, kind: output, shape index: {1}]  }
   0x1   :  { %11 = vsyncpa [#allocation6], 0 }
   0x2   :  { %12 = vsyncpa [#allocation4], 0 }
   0x3   :  { %13 = vsyncpa [#allocation10], 0  ;;  %s367_s15 = smov [#allocation5]   ;;  %s368_s17 = smov [#allocation2]  }
   0x4   :  { %s30_s16 = sshll.u32 %s367_s15, 4  ;;  %s20_s18 = sshll.u32 %s368_s17, 4  ;;  %s31_s16 = int_to_ptr.vmem [resolvable:$true] %s30_s16  ;;  %s21_s18 = int_to_ptr.vmem [resolvable:$true] %s20_s18 }
   0x5   :  { %s249_s21 = scalar_lea.hbm %s470_s1, 128 }
   0x6   :  { %p250_p0 = scmp.ne.s32.totalorder %s470_s1, %s249_s21  ;;  %p253_p1 = scmp.lt.u32.totalorder %s249_s21, %s470_s1 }
   0x8   :  { %p255_p2 = pnand %p253_p1, %p250_p0 }
   0xa   :  { %258 = shalt.err (!%p255_p2)
}
   0xb   :  { %s259_s26 = scalar_lea.vmem %s31_s16, 128  ;;  %p264_p4 = scmp.lt.s32.totalorder %s31_s16, %s31_s16 }
   0xc   :  { %p260_p3 = scmp.ne.s32.totalorder %s31_s16, %s259_s26  ;;  %p265_p5 = scmp.lt.s32.totalorder %s259_s26, %s259_s26 }
   0xe   :  { %p266_p6 = por %p265_p5, %p264_p4 }
  0x10   :  { %p267_p7 = pnand %p266_p6, %p260_p3 }
  0x12   :  { %270 = shalt.err (!%p267_p7)
}
  0x13   :  { %33 = dma.hbm_to_vmem [thread:$0]  %s470_s1, 128, %s31_s16, [#allocation6]  }
  0x14   :  { %s271_s5 = scalar_lea.hbm %s469_s0, 128 }
  0x15   :  { %p272_p8 = scmp.ne.s32.totalorder %s469_s0, %s271_s5  ;;  %p275_p9 = scmp.lt.u32.totalorder %s271_s5, %s469_s0 }
  0x17   :  { %p277_p10 = pnand %p275_p9, %p272_p8 }
  0x19   :  { %280 = shalt.err (!%p277_p10)
}
  0x1a   :  { %s281_s10 = scalar_lea.vmem %s21_s18, 128  ;;  %p286_p12 = scmp.lt.s32.totalorder %s21_s18, %s21_s18 }
  0x1b   :  { %p282_p11 = scmp.ne.s32.totalorder %s21_s18, %s281_s10  ;;  %p287_p13 = scmp.lt.s32.totalorder %s281_s10, %s281_s10 }
  0x1d   :  { %p288_p0 = por %p287_p13, %p286_p12 }
  0x1f   :  { %p289_p1 = pnand %p288_p0, %p282_p11 }
  0x21   :  { %292 = shalt.err (!%p289_p1)
}
  0x22   :  { %23 = dma.hbm_to_vmem [thread:$0]  %s469_s0, 128, %s21_s18, [#allocation3]  }
  0x23   :  { %s369_s12 = smov [#allocation7]   ;;  %s293_s16 = scalar_lea.hbm %s471_s2, 128 }
  0x24   :  { %s40_s13 = sshll.u32 %s369_s12, 4  ;;  %p294_p2 = scmp.ne.s32.totalorder %s471_s2, %s293_s16  ;;  %s41_s13 = int_to_ptr.vmem [resolvable:$true] %s40_s13 }
  0x25   :  { %p297_p3 = scmp.lt.u32.totalorder %s293_s16, %s471_s2 }
  0x27   :  { %p299_p4 = pnand %p297_p3, %p294_p2 }
  0x29   :  { %302 = shalt.err (!%p299_p4)
}
  0x2a   :  { %s303_s22 = scalar_lea.vmem %s41_s13, 128  ;;  %p308_p6 = scmp.lt.s32.totalorder %s41_s13, %s41_s13 }
  0x2b   :  { %p304_p5 = scmp.ne.s32.totalorder %s41_s13, %s303_s22  ;;  %p309_p7 = scmp.lt.s32.totalorder %s303_s22, %s303_s22 }
  0x2d   :  { %p310_p8 = por %p309_p7, %p308_p6 }
  0x2f   :  { %p311_p9 = pnand %p310_p8, %p304_p5 }
  0x31   :  { %314 = shalt.err (!%p311_p9)
}
  0x32   :  { %43 = dma.hbm_to_vmem [thread:$0]  %s471_s2, 128, %s41_s13, [#allocation6]  }
  0x33   :  { %359 = dma.done.wait [#allocation3], 128  }
  0x34   :  { %360 = vsyncadd [#allocation3], 4294967168 }
  0x35   :  { %361 = dma.done.wait [#allocation6], 256  }
  0x36   :  { %362 = vsyncadd [#allocation6], 4294967040  ;;  %v53_v0 = vld [vmem:[#allocation2] sm:$0xff]  ;;  %v54_v10 = vld [vmem:[#allocation5] sm:$0xff]  ;;  %v370_v31 = vmov 0.0   ;;  %s371_s2 = smov [#allocation8]  }
  0x37   :  { %v220_v1 = vmul.f32 -1.442695, %v53_v0  ;;  %v68_v2 = vand.u32 2147483647, %v53_v0  ;;  %v65_v13 = vmax.f32 %v53_v0, 0.0  ;;  %v66_v14 = vmul.f32 %v54_v10, %v53_v0  ;;  %v55_v23 = vld [vmem:[#allocation7] sm:$0xff] }
  0x38   :  { %vm56_vm1 = vcmp.gt.f32.partialorder %v55_v23, 0.0  ;;  %s191_s23 = sshll.u32 %s371_s2, 4  ;;  %s372_s24 = smov [#allocation9]   ;;  %s192_s23 = int_to_ptr.vmem [resolvable:$true] %s191_s23 }
  0x39   :  { %241 = vpow2.f32 %v220_v1  ;;  %v69_v3 = vsub.f32 0.0, %v68_v2  ;;  %v67_v20 = vsub.f32 %v65_v13, %v66_v14  ;;  %s203_s25 = sshll.u32 %s372_s24, 4  ;;  %s315_s26 = scalar_lea.vmem %s192_s23, 1280  ;;  %s438_s25 = int_to_ptr.vmem [resolvable:$true] %s203_s25 }
  0x3a   :  { %p316_p10 = scmp.ne.s32.totalorder %s192_s23, %s315_s26  ;;  %p320_p11 = scmp.lt.s32.totalorder %s192_s23, %s192_s23 }
  0x3b   :  { %v70_v4 = vmul.f32 1.442695, %v69_v3  ;;  %p321_p12 = scmp.lt.s32.totalorder %s315_s26, %s315_s26 }
  0x3d   :  { %243 = vpow2.f32 %v70_v4  ;;  %p322_p13 = por %p321_p12, %p320_p11 }
  0x3f   :  { %p323_p0 = pnand %p322_p13, %p316_p10 }
  0x43   :  { %v242_v5 = vpop.eup %241 }
  0x44   :  { %v60_v6 = vadd.f32 1.0, %v242_v5 }
  0x46   :  { %245 = vrcp.f32 %v60_v6 }
  0x47   :  { %v244_v7 = vpop.eup %243 }
  0x48   :  { %v72_v8 = vadd.f32 1.0, %v244_v7  ;;  %v75_v9 = vmul.f32 -0.5, %v244_v7  ;;  %v78_v15 = vand.u32 2147483647, %v244_v7 }
  0x4a   :  { %247 = vlog2.f32 %v72_v8  ;;  %v76_v11 = vadd.f32 1.0, %v75_v9  ;;  %vm79_vm0 = vcmp.lt.f32.partialorder %v78_v15, 0.0004427343 }
  0x4c   :  { %v77_v18 = vmul.f32 %v244_v7, %v76_v11 }
  0x50   :  { %v246_v12 = vpop.eup %245 }
  0x51   :  { %v63_v16 = vsub.f32 %v246_v12, %v54_v10 }
  0x53   :  { %v64_v17 = vand.u32 2147483647, %v63_v16 }
  0x54   :  { %v248_v19 = vpop.eup %247 }
  0x55   :  { %v83_v21 = vmul.f32 10.0, %v64_v17  ;;  %v74_v22 = vmul.f32 0.6931472, %v248_v19 }
  0x57   :  { %v231_v24 = vtrunc.f32 %v83_v21  ;;  %v80_v25 = vsel %vm79_vm0, %v77_v18, %v74_v22 }
  0x58   :  { %v81_v26 = vadd.f32 %v80_v25, %v67_v20 }
  0x59   :  { %v232_v27 = vcvt.f32.s32 %v231_v24 }
  0x5a   :  { %v82_v29 = vsel %vm56_vm1, %v81_v26, 0.0 }
  0x5b   :  { %vm85_vm2 = vcmp.lt.s32.totalorder %v232_v27, 9 }
  0x5c   :  { %v86_v28 = vsel %vm85_vm2, %v232_v27, 9 }
  0x5d   :  { %v87_v30 = vsel %vm56_vm1, %v86_v28, 10 }
  0x5e   :  { %vm88_vm3 = vcmp.eq.s32.totalorder %v87_v30, 0  ;;  %vm96_vm4 = vcmp.eq.s32.totalorder %v87_v30, 1  ;;  %vm106_vm5 = vcmp.eq.s32.totalorder %v87_v30, 2  ;;  %vm116_vm6 = vcmp.eq.s32.totalorder %v87_v30, 3 }
  0x5f   :  { %v221_v32 = vsel %vm88_vm3, 1.0, %v370_v31  ;;  %v93_v33 = vsel %vm88_vm3, %v82_v29, 0.0  ;;  %v222_v34 = vsel %vm96_vm4, 1.0, %v370_v31  ;;  %v102_v35 = vsel %vm96_vm4, %v82_v29, 0.0 }
  0x60   :  { %92 = vst [vmem:[#allocation8] sm:$0xff] %v221_v32  ;;  %95 = vst [vmem:[#allocation9] sm:$0xff] %v93_v33  ;;  %v223_v36 = vsel %vm106_vm5, 1.0, %v370_v31  ;;  %v112_v37 = vsel %vm106_vm5, %v82_v29, 0.0  ;;  %v224_v38 = vsel %vm116_vm6, 1.0, %v370_v31  ;;  %v122_v39 = vsel %vm116_vm6, %v82_v29, 0.0 }
  0x61   :  { %101 = vst [vmem:[#allocation8 + $0x8] sm:$0xff] %v222_v34  ;;  %105 = vst [vmem:[#allocation9 + $0x8] sm:$0xff] %v102_v35  ;;  %vm126_vm7 = vcmp.eq.s32.totalorder %v87_v30, 4  ;;  %vm136_vm8 = vcmp.eq.s32.totalorder %v87_v30, 5  ;;  %vm146_vm9 = vcmp.eq.s32.totalorder %v87_v30, 6  ;;  %vm156_vm10 = vcmp.eq.s32.totalorder %v87_v30, 7 }
  0x62   :  { %111 = vst [vmem:[#allocation8 + $0x10] sm:$0xff] %v223_v36  ;;  %115 = vst [vmem:[#allocation9 + $0x10] sm:$0xff] %v112_v37  ;;  %v225_v40 = vsel %vm126_vm7, 1.0, %v370_v31  ;;  %v132_v41 = vsel %vm126_vm7, %v82_v29, 0.0  ;;  %v226_v42 = vsel %vm136_vm8, 1.0, %v370_v31  ;;  %v142_v43 = vsel %vm136_vm8, %v82_v29, 0.0 }
  0x63   :  { %121 = vst [vmem:[#allocation8 + $0x18] sm:$0xff] %v224_v38  ;;  %125 = vst [vmem:[#allocation9 + $0x18] sm:$0xff] %v122_v39  ;;  %v227_v44 = vsel %vm146_vm9, 1.0, %v370_v31  ;;  %v152_v45 = vsel %vm146_vm9, %v82_v29, 0.0  ;;  %v228_v46 = vsel %vm156_vm10, 1.0, %v370_v31  ;;  %v162_v47 = vsel %vm156_vm10, %v82_v29, 0.0 }
  0x64   :  { %131 = vst [vmem:[#allocation8 + $0x20] sm:$0xff] %v225_v40  ;;  %135 = vst [vmem:[#allocation9 + $0x20] sm:$0xff] %v132_v41  ;;  %vm166_vm11 = vcmp.eq.s32.totalorder %v87_v30, 8  ;;  %vm176_vm12 = vcmp.eq.s32.totalorder %v87_v30, 9 }
  0x65   :  { %141 = vst [vmem:[#allocation8 + $0x28] sm:$0xff] %v226_v42  ;;  %145 = vst [vmem:[#allocation9 + $0x28] sm:$0xff] %v142_v43  ;;  %v229_v48 = vsel %vm166_vm11, 1.0, %v370_v31  ;;  %v172_v49 = vsel %vm166_vm11, %v82_v29, 0.0  ;;  %v230_v50 = vsel %vm176_vm12, 1.0, %v370_v31  ;;  %v182_v51 = vsel %vm176_vm12, %v82_v29, 0.0 }
  0x66   :  { %151 = vst [vmem:[#allocation8 + $0x30] sm:$0xff] %v227_v44  ;;  %155 = vst [vmem:[#allocation9 + $0x30] sm:$0xff] %v152_v45 }
  0x67   :  { %161 = vst [vmem:[#allocation8 + $0x38] sm:$0xff] %v228_v46  ;;  %165 = vst [vmem:[#allocation9 + $0x38] sm:$0xff] %v162_v47 }
  0x68   :  { %171 = vst [vmem:[#allocation8 + $0x40] sm:$0xff] %v229_v48  ;;  %175 = vst [vmem:[#allocation9 + $0x40] sm:$0xff] %v172_v49 }
  0x69   :  { %181 = vst [vmem:[#allocation8 + $0x48] sm:$0xff] %v230_v50  ;;  %185 = vst [vmem:[#allocation9 + $0x48] sm:$0xff] %v182_v51 }
  0x6a   :  { %326 = shalt.err (!%p323_p0)
}
  0x6b   :  { %s327_s29 = scalar_lea.hbm %s472_s3, 1280 }
  0x6c   :  { %p328_p1 = scmp.ne.s32.totalorder %s472_s3, %s327_s29  ;;  %p331_p2 = scmp.lt.u32.totalorder %s327_s29, %s472_s3 }
  0x6e   :  { %p333_p3 = pnand %p331_p2, %p328_p1 }
  0x70   :  { %336 = shalt.err (!%p333_p3)
}
  0x71   :  { %s373_s8 = smov 128   ;;  %s374_s9 = smov 8  }
  0x72   :  { %197 = dma.vmem_to_hbm [thread:$0]  %s192_s23, 1280, %s472_s3, [#allocation4], %s373_s8, %s373_s8, %s374_s9  }
  0x73   :  { %s337_s11 = scalar_lea.vmem %s438_s25, 1280  ;;  %p342_p5 = scmp.lt.s32.totalorder %s438_s25, %s438_s25 }
  0x74   :  { %p338_p4 = scmp.ne.s32.totalorder %s438_s25, %s337_s11  ;;  %p343_p6 = scmp.lt.s32.totalorder %s337_s11, %s337_s11 }
  0x76   :  { %p344_p7 = por %p343_p6, %p342_p5 }
  0x78   :  { %p345_p8 = pnand %p344_p7, %p338_p4 }
  0x7a   :  { %348 = shalt.err (!%p345_p8)
}
  0x7b   :  { %s349_s14 = scalar_lea.hbm %s473_s4, 1280 }
  0x7c   :  { %p350_p9 = scmp.ne.s32.totalorder %s473_s4, %s349_s14  ;;  %p353_p10 = scmp.lt.u32.totalorder %s349_s14, %s473_s4 }
  0x7e   :  { %p355_p11 = pnand %p353_p10, %p350_p9 }
  0x80   :  { %358 = shalt.err (!%p355_p11)
}
  0x81   :  { %209 = dma.vmem_to_hbm [thread:$0]  %s438_s25, 1280, %s473_s4, [#allocation10], %s373_s8, %s373_s8, %s374_s9  }
  0x82   :  { %363 = dma.done.wait [#allocation4], 1280  }
  0x83   :  { %364 = vsyncadd [#allocation4], 4294966016 }
  0x84   :  { %365 = dma.done.wait [#allocation10], 1280  }
  0x85   :  { %366 = vsyncadd [#allocation10], 4294966016 }
  0x86   :  { %216 = vsyncpa [#allocation3], 1 }
  0x87   :  { %217 = vsyncpa [#allocation6], 1 }
  0x88   :  { %218 = vsyncpa [#allocation4], 1 }
  0x89   :  { %219 = vsyncpa [#allocation10], 1 }

</bundles_post_ra>
